<compile_context>
chip_gen: v6e
topology: v6e:2x2x1
jax: 0.10.0
libtpu: 0.0.40
codegen_flags: <defaults>
</compile_context>

<pallas_src>
import functools

import jax
import jax.numpy as jnp
from jax import lax
from jax.experimental import pallas as pl
from jax.experimental.pallas import tpu as pltpu

BN_EPS = 1e-5
VMEM_LIMIT_BYTES = 32 * 1024 * 1024          # explicit scoped-VMEM cap, safe on v5e/v6e/v7x
BLOCK_BUDGET_BYTES = VMEM_LIMIT_BYTES // 8   # ~4 MiB per block: 2x-buffered in + out fits easily


def _pick_hw_tile(c, hw, itemsize):
    """Largest lane tile (multiple of 128, or full extent) within the per-block budget."""
    max_lanes = max(128, BLOCK_BUDGET_BYTES // max(1, c * itemsize))
    if hw <= max_lanes:
        return hw  # full extent is always a legal block dim
    return max(128, (max_lanes // 128) * 128)


# --------------------------------------------------------------------------- #
# Pass 1: per-(n, channel) sum and sum-of-squares (single sweep over x).
# --------------------------------------------------------------------------- #
def _stats_kernel(x_ref, sum_ref, sq_ref, *, hw_total):
    t = pl.program_id(1)

    @pl.when(t == 0)
    def _():
        sum_ref[...] = jnp.zeros_like(sum_ref)
        sq_ref[...] = jnp.zeros_like(sq_ref)

    x = x_ref[...].astype(jnp.float32)          # (C, hw_tile)
    c, hw_tile = x.shape

    if hw_total % hw_tile != 0:
        # Mask padded lanes of the tail tile so they don't corrupt the batch statistics.
        # (Cheap VPU compare+select; pure filler under the HBM-bound roofline.)
        lane = lax.broadcasted_iota(jnp.int32, (c, hw_tile), 1)
        mask = (lane + t * hw_tile) < hw_total
        x = jnp.where(mask, x, 0.0)

    sum_ref[...] += jnp.sum(x, axis=1, keepdims=True)
    sq_ref[...] += jnp.sum(x * x, axis=1, keepdims=True)


# --------------------------------------------------------------------------- #
# Pass 2: out = sigmoid(x * scale + bias) * x   (BN + channel weight prefolded)
# --------------------------------------------------------------------------- #
def _apply_kernel(x_ref, scale_ref, bias_ref, o_ref):
    xf = x_ref[...].astype(jnp.float32)         # (C, hw_tile)
    gate = jax.nn.sigmoid(xf * scale_ref[...] + bias_ref[...])
    o_ref[...] = (gate * xf).astype(o_ref.dtype)


@functools.partial(jax.jit, static_argnames=("hw_tile",))
def eam_block_forward(x_nchw, gamma, beta, *, hw_tile=None):
    """x_nchw: (N, C, H, W). Returns (N, C, H, W)."""
    n, c, h, w = x_nchw.shape
    hw = h * w
    x3d = x_nchw.reshape(n, c, hw)              # free reshape, no HBM transpose

    if hw_tile is None:
        hw_tile = _pick_hw_tile(c, hw, jnp.dtype(x_nchw.dtype).itemsize)
    num_t = pl.cdiv(hw, hw_tile)

    # ----- pass 1: tiled per-channel statistics (reduction over the tile axis) -----
    part_sum, part_sq = pl.pallas_call(
        functools.partial(_stats_kernel, hw_total=hw),
        out_shape=(
            jax.ShapeDtypeStruct((n, c, 1), jnp.float32),
            jax.ShapeDtypeStruct((n, c, 1), jnp.float32),
        ),
        grid=(n, num_t),
        in_specs=[pl.BlockSpec((None, c, hw_tile), lambda i, t: (i, 0, t))],
        out_specs=(
            pl.BlockSpec((None, c, 1), lambda i, t: (i, 0, 0)),
            pl.BlockSpec((None, c, 1), lambda i, t: (i, 0, 0)),
        ),
        compiler_params=pltpu.CompilerParams(
            dimension_semantics=("parallel", "arbitrary"),
            vmem_limit_bytes=VMEM_LIMIT_BYTES,
        ),
    )(x3d)

    # ----- tiny (C,)-sized glue: fold BN affine + |gamma|/sum|gamma| into scale/bias -----
    count = jnp.float32(n * hw)
    ch_sum = jnp.sum(part_sum[:, :, 0], axis=0)                 # (C,)
    ch_sq = jnp.sum(part_sq[:, :, 0], axis=0)                   # (C,)
    mean = ch_sum / count
    var = jnp.maximum(ch_sq / count - mean * mean, 0.0)         # biased (training-mode) var
    inv_std = lax.rsqrt(var + BN_EPS)
    g = gamma.astype(jnp.float32)
    b = beta.astype(jnp.float32)
    w_ch = jnp.abs(g) / jnp.sum(jnp.abs(g))
    scale = (inv_std * g * w_ch).reshape(c, 1)                  # (C, 1)
    bias = ((b - mean * inv_std * g) * w_ch).reshape(c, 1)      # (C, 1)

    # ----- pass 2: tiled, fully parallel apply (BN + gate + residual multiply) -----
    out3d = pl.pallas_call(
        _apply_kernel,
        out_shape=jax.ShapeDtypeStruct((n, c, hw), x_nchw.dtype),
        grid=(n, num_t),
        in_specs=[
            pl.BlockSpec((None, c, hw_tile), lambda i, t: (i, 0, t)),
            pl.BlockSpec((c, 1), lambda i, t: (0, 0)),
            pl.BlockSpec((c, 1), lambda i, t: (0, 0)),
        ],
        out_specs=pl.BlockSpec((None, c, hw_tile), lambda i, t: (i, 0, t)),
        compiler_params=pltpu.CompilerParams(
            dimension_semantics=("parallel", "parallel"),
            vmem_limit_bytes=VMEM_LIMIT_BYTES,
        ),
    )(x3d, scale, bias)

    return out3d.reshape(n, c, h, w)


def eam_block_reference(x_nchw, gamma, beta):
    """Pure-JAX reference matching PyTorch training-mode Channel_Att."""
    x = x_nchw.astype(jnp.float32)
    mean = jnp.mean(x, axis=(0, 2, 3), keepdims=True)
    var = jnp.mean((x - mean) ** 2, axis=(0, 2, 3), keepdims=True)
    g = gamma.reshape(1, -1, 1, 1)
    b = beta.reshape(1, -1, 1, 1)
    x_bn = (x - mean) / jnp.sqrt(var + BN_EPS) * g + b
    w = jnp.abs(g) / jnp.sum(jnp.abs(gamma))
    return (jax.nn.sigmoid(x_bn * w) * x).astype(x_nchw.dtype)


if __name__ == "__main__":
    key = jax.random.PRNGKey(0)
    kx, kg, kb, kx2 = jax.random.split(key, 4)

    N, C, H, W = 2, 4, 16, 16
    x = jax.random.normal(kx, (N, C, H, W), dtype=jnp.float32)

    # Deterministic synthetic BatchNorm2d parameters (affine=True).
    gamma = 1.0 + 0.1 * jax.random.normal(kg, (C,), dtype=jnp.float32)
    beta = 0.1 * jax.random.normal(kb, (C,), dtype=jnp.float32)

    out = jax.block_until_ready(eam_block_forward(x, gamma, beta))
    ref = eam_block_reference(x, gamma, beta)
    assert out.shape == (N, C, H, W)
    assert jnp.allclose(out, ref, atol=2e-5, rtol=2e-5), "mismatch vs reference"

    # Robustness check: multi-tile reduction + tail-masking path (H*W not a multiple of tile).
    x2 = jax.random.normal(kx2, (2, 4, 16, 20), dtype=jnp.float32)
    out2 = jax.block_until_ready(eam_block_forward(x2, gamma, beta, hw_tile=128))
    ref2 = eam_block_reference(x2, gamma, beta)
    assert jnp.allclose(out2, ref2, atol=2e-5, rtol=2e-5), "mismatch vs reference (tiled/tail)"

    print("KERNEL_OK")
</pallas_src>

<mosaic_0001>
module attributes {stable_mosaic.version = 11 : i64} {
  func.func @_stats_kernel(%arg0: i32, %arg1: i32, %arg2: memref<1x4x256xf32, #tpu.memory_space<vmem>>, %arg3: memref<1x4x1xf32, #tpu.memory_space<vmem>>, %arg4: memref<1x4x1xf32, #tpu.memory_space<vmem>>) attributes {dimension_semantics = [#tpu.dimension_semantics<parallel>, #tpu.dimension_semantics<arbitrary>], iteration_bounds = array<i64: 2, 1>, scalar_prefetch = 0 : i64, scratch_operands = 0 : i64, tpu.core_type = #tpu.core_type<tc>, window_params = [{transform_indices = @transform_0, window_bounds = array<i64: 1, 4, 256>}, {transform_indices = @transform_1, window_bounds = array<i64: 1, 4, 1>}, {transform_indices = @transform_2, window_bounds = array<i64: 1, 4, 1>}]} {
    %c0_i32 = arith.constant 0 : i32
    %0 = arith.cmpi eq, %arg1, %c0_i32 : i32
    %1 = arith.extui %0 : i1 to i32
    %c0_i32_0 = arith.constant 0 : i32
    %2 = arith.cmpi ne, %1, %c0_i32_0 : i32
    scf.if %2 {
      %cst_16 = arith.constant 0.000000e+00 : f32
      %22 = vector.broadcast %cst_16 : f32 to vector<4x1xf32>
      %c0_17 = arith.constant 0 : index
      %c0_18 = arith.constant 0 : index
      %c0_19 = arith.constant 0 : index
      %23 = vector.load %arg3[%c0_17, %c0_18, %c0_19] : memref<1x4x1xf32, #tpu.memory_space<vmem>>, vector<1x4x1xf32>
      %24 = vector.shape_cast %23 : vector<1x4x1xf32> to vector<4x1xf32>
      %25 = vector.shape_cast %22 : vector<4x1xf32> to vector<1x4x1xf32>
      tpu.vector_store %arg3[%c0_17, %c0_18, %c0_19], %25 {strides = array<i32>} : memref<1x4x1xf32, #tpu.memory_space<vmem>>, vector<1x4x1xf32>,
      %cst_20 = arith.constant 0.000000e+00 : f32
      %26 = vector.broadcast %cst_20 : f32 to vector<4x1xf32>
      %c0_21 = arith.constant 0 : index
      %c0_22 = arith.constant 0 : index
      %c0_23 = arith.constant 0 : index
      %27 = vector.load %arg4[%c0_21, %c0_22, %c0_23] : memref<1x4x1xf32, #tpu.memory_space<vmem>>, vector<1x4x1xf32>
      %28 = vector.shape_cast %27 : vector<1x4x1xf32> to vector<4x1xf32>
      %29 = vector.shape_cast %26 : vector<4x1xf32> to vector<1x4x1xf32>
      tpu.vector_store %arg4[%c0_21, %c0_22, %c0_23], %29 {strides = array<i32>} : memref<1x4x1xf32, #tpu.memory_space<vmem>>, vector<1x4x1xf32>,
    } else {
    }
    %c0 = arith.constant 0 : index
    %c0_1 = arith.constant 0 : index
    %c0_2 = arith.constant 0 : index
    %3 = vector.load %arg2[%c0, %c0_1, %c0_2] : memref<1x4x256xf32, #tpu.memory_space<vmem>>, vector<1x4x256xf32>
    %4 = vector.shape_cast %3 : vector<1x4x256xf32> to vector<4x256xf32>
    %c0_3 = arith.constant 0 : index
    %c0_4 = arith.constant 0 : index
    %c0_5 = arith.constant 0 : index
    %5 = vector.load %arg3[%c0_3, %c0_4, %c0_5] : memref<1x4x1xf32, #tpu.memory_space<vmem>>, vector<1x4x1xf32>
    %6 = vector.shape_cast %5 : vector<1x4x1xf32> to vector<4x1xf32>
    %cst = arith.constant dense<0.000000e+00> : vector<4xf32>
    %7 = vector.multi_reduction <add>, %4, %cst [1] : vector<4x256xf32> to vector<4xf32>
    %8 = vector.shape_cast %7 : vector<4xf32> to vector<4x1xf32>
    %9 = arith.addf %6, %8 : vector<4x1xf32>
    %c0_6 = arith.constant 0 : index
    %c0_7 = arith.constant 0 : index
    %c0_8 = arith.constant 0 : index
    %10 = vector.load %arg3[%c0_6, %c0_7, %c0_8] : memref<1x4x1xf32, #tpu.memory_space<vmem>>, vector<1x4x1xf32>
    %11 = vector.shape_cast %10 : vector<1x4x1xf32> to vector<4x1xf32>
    %12 = vector.shape_cast %9 : vector<4x1xf32> to vector<1x4x1xf32>
    tpu.vector_store %arg3[%c0_6, %c0_7, %c0_8], %12 {strides = array<i32>} : memref<1x4x1xf32, #tpu.memory_space<vmem>>, vector<1x4x1xf32>,
    %c0_9 = arith.constant 0 : index
    %c0_10 = arith.constant 0 : index
    %c0_11 = arith.constant 0 : index
    %13 = vector.load %arg4[%c0_9, %c0_10, %c0_11] : memref<1x4x1xf32, #tpu.memory_space<vmem>>, vector<1x4x1xf32>
    %14 = vector.shape_cast %13 : vector<1x4x1xf32> to vector<4x1xf32>
    %15 = arith.mulf %4, %4 : vector<4x256xf32>
    %cst_12 = arith.constant dense<0.000000e+00> : vector<4xf32>
    %16 = vector.multi_reduction <add>, %15, %cst_12 [1] : vector<4x256xf32> to vector<4xf32>
    %17 = vector.shape_cast %16 : vector<4xf32> to vector<4x1xf32>
    %18 = arith.addf %14, %17 : vector<4x1xf32>
    %c0_13 = arith.constant 0 : index
    %c0_14 = arith.constant 0 : index
    %c0_15 = arith.constant 0 : index
    %19 = vector.load %arg4[%c0_13, %c0_14, %c0_15] : memref<1x4x1xf32, #tpu.memory_space<vmem>>, vector<1x4x1xf32>
    %20 = vector.shape_cast %19 : vector<1x4x1xf32> to vector<4x1xf32>
    %21 = vector.shape_cast %18 : vector<4x1xf32> to vector<1x4x1xf32>
    tpu.vector_store %arg4[%c0_13, %c0_14, %c0_15], %21 {strides = array<i32>} : memref<1x4x1xf32, #tpu.memory_space<vmem>>, vector<1x4x1xf32>,
    return
  }
  func.func @transform_0(%arg0: i32, %arg1: i32) -> (i32, i32, i32) {
    %c0_i32 = arith.constant 0 : i32
    %c0_i32_0 = arith.constant 0 : i32
    return %arg0, %c0_i32, %arg1 : i32, i32, i32
  }
  func.func @transform_1(%arg0: i32, %arg1: i32) -> (i32, i32, i32) {
    %c0_i32 = arith.constant 0 : i32
    %c0_i32_0 = arith.constant 0 : i32
    %c0_i32_1 = arith.constant 0 : i32
    return %arg0, %c0_i32, %c0_i32_0 : i32, i32, i32
  }
  func.func @transform_2(%arg0: i32, %arg1: i32) -> (i32, i32, i32) {
    %c0_i32 = arith.constant 0 : i32
    %c0_i32_0 = arith.constant 0 : i32
    %c0_i32_1 = arith.constant 0 : i32
    return %arg0, %c0_i32, %c0_i32_0 : i32, i32, i32
  }
}

module attributes {stable_mosaic.version = 11 : i64} {
  func.func @_apply_kernel(%arg0: i32, %arg1: i32, %arg2: memref<1x4x256xf32, #tpu.memory_space<vmem>>, %arg3: memref<4x1xf32, #tpu.memory_space<vmem>>, %arg4: memref<4x1xf32, #tpu.memory_space<vmem>>, %arg5: memref<1x4x256xf32, #tpu.memory_space<vmem>>) attributes {dimension_semantics = [#tpu.dimension_semantics<parallel>, #tpu.dimension_semantics<parallel>], iteration_bounds = array<i64: 2, 1>, scalar_prefetch = 0 : i64, scratch_operands = 0 : i64, tpu.core_type = #tpu.core_type<tc>, window_params = [{transform_indices = @transform_0, window_bounds = array<i64: 1, 4, 256>}, {pipeline_mode = #tpu.pipeline_mode<synchronous>, transform_indices = @transform_1, window_bounds = array<i64: 4, 1>}, {pipeline_mode = #tpu.pipeline_mode<synchronous>, transform_indices = @transform_2, window_bounds = array<i64: 4, 1>}, {transform_indices = @transform_3, window_bounds = array<i64: 1, 4, 256>}]} {
    %c0 = arith.constant 0 : index
    %c0_0 = arith.constant 0 : index
    %c0_1 = arith.constant 0 : index
    %0 = vector.load %arg2[%c0, %c0_0, %c0_1] : memref<1x4x256xf32, #tpu.memory_space<vmem>>, vector<1x4x256xf32>
    %1 = vector.shape_cast %0 : vector<1x4x256xf32> to vector<4x256xf32>
    %c0_2 = arith.constant 0 : index
    %c0_3 = arith.constant 0 : index
    %2 = vector.load %arg3[%c0_2, %c0_3] : memref<4x1xf32, #tpu.memory_space<vmem>>, vector<4x1xf32>
    %3 = vector.broadcast %2 : vector<4x1xf32> to vector<4x256xf32>
    %4 = arith.mulf %1, %3 : vector<4x256xf32>
    %c0_4 = arith.constant 0 : index
    %c0_5 = arith.constant 0 : index
    %5 = vector.load %arg4[%c0_4, %c0_5] : memref<4x1xf32, #tpu.memory_space<vmem>>, vector<4x1xf32>
    %6 = vector.broadcast %5 : vector<4x1xf32> to vector<4x256xf32>
    %7 = arith.addf %4, %6 : vector<4x256xf32>
    %8 = arith.negf %7 : vector<4x256xf32>
    %9 = math.exp %8 : vector<4x256xf32>
    %cst = arith.constant 1.000000e+00 : f32
    %10 = vector.broadcast %cst : f32 to vector<4x256xf32>
    %11 = arith.addf %10, %9 : vector<4x256xf32>
    %12 = arith.divf %10, %11 : vector<4x256xf32>
    %13 = arith.mulf %12, %1 : vector<4x256xf32>
    %c0_6 = arith.constant 0 : index
    %c0_7 = arith.constant 0 : index
    %c0_8 = arith.constant 0 : index
    %14 = vector.load %arg5[%c0_6, %c0_7, %c0_8] : memref<1x4x256xf32, #tpu.memory_space<vmem>>, vector<1x4x256xf32>
    %15 = vector.shape_cast %14 : vector<1x4x256xf32> to vector<4x256xf32>
    %16 = vector.shape_cast %13 : vector<4x256xf32> to vector<1x4x256xf32>
    tpu.vector_store %arg5[%c0_6, %c0_7, %c0_8], %16 {strides = array<i32>} : memref<1x4x256xf32, #tpu.memory_space<vmem>>, vector<1x4x256xf32>,
    return
  }
  func.func @transform_0(%arg0: i32, %arg1: i32) -> (i32, i32, i32) {
    %c0_i32 = arith.constant 0 : i32
    %c0_i32_0 = arith.constant 0 : i32
    return %arg0, %c0_i32, %arg1 : i32, i32, i32
  }
  func.func @transform_1(%arg0: i32, %arg1: i32) -> (i32, i32) {
    %c0_i32 = arith.constant 0 : i32
    %c0_i32_0 = arith.constant 0 : i32
    %c0_i32_1 = arith.constant 0 : i32
    return %c0_i32, %c0_i32_0 : i32, i32
  }
  func.func @transform_2(%arg0: i32, %arg1: i32) -> (i32, i32) {
    %c0_i32 = arith.constant 0 : i32
    %c0_i32_0 = arith.constant 0 : i32
    %c0_i32_1 = arith.constant 0 : i32
    return %c0_i32, %c0_i32_0 : i32, i32
  }
  func.func @transform_3(%arg0: i32, %arg1: i32) -> (i32, i32, i32) {
    %c0_i32 = arith.constant 0 : i32
    %c0_i32_0 = arith.constant 0 : i32
    return %arg0, %c0_i32, %arg1 : i32, i32, i32
  }
}

</mosaic_0001>

<bundles_post_ra>
// kernel: eam_block_forward.2
= control target key start
LH: loop header
LB: loop body
LE: loop exit
PB: predicated region body
PF: predicated region fallthrough
CT: control target
= control target key end

     0   :  { %s390_s9 = smov 0   ;;  %s392_s10 = smov 0   ;;  %s430_s0 = inlined_call_operand.vmem [shape: f32[2,4,256], index: 0, kind: input, shape index: {}]   ;;  %s431_s1 = inlined_call_operand.vmem [shape: f32[2,4,1], index: 1, kind: output, shape index: {0}]   ;;  %s432_s2 = inlined_call_operand.vmem [shape: f32[2,4,1], index: 2, kind: output, shape index: {1}]  }
   0x1   :  { %s394_s11 = smov 0  }
   0x2 LB: > { %s25_s12 = sadd.s32 1, %s368_s10  ;;  %p316_p0 = scmp.ge.s32.totalorder %s372_s11, 1  ;;  %s372_s11 = sphi %s394_s11, %s13_s11   ;;  %s368_s10 = sphi %s392_s10, %s434_s10   ;;  %s364_s9 = sphi %s390_s9, %s433_s9  }
   0x3   : > { %p27_p1 = scmp.ge.s32.totalorder %s25_s12, 2  ;;  %p134_p2 = scmp.lt.s32.totalorder %s372_s11, 3 }
   0x5   : > { %s436_s12 = smov (%p27_p1, %s25_s12), 0  ;;  %p135_p3 = pnand %p316_p0, %p134_p2 }
   0x6   : > { %p164_p4 = scmp.lt.s32.totalorder (!%p135_p3), %s364_s9, 1 }
   0x7   : > { %138 = sbr.rel (%p135_p3) target bundleno = 166 (0xa6), region = 24 }
   0xc   : > { %s438_s9 = smov (!%p164_p4, %s364_s9), 1  ;;  %vm185_vm0 = vcmask 3072   ;;  %vm193_vm1 = vcmask 1043456   ;;  %v374_v1 = vmov 0.0  }
   0xd   : > { %s323_s13 = sshll.u32 %s438_s9, 3  ;;  %s319_s14 = sshll.u32 %s438_s9, 2 }
   0xe   : > { %s171_s17 = scalar_lea.vmem %s430_s0, %s323_s13  ;;  %s176_s20 = scalar_lea.vmem %s431_s1, %s319_s14 }
   0xf   : > { %v188_v0 = vld [vmem:[%s171_s17] sm:$0xff]  ;;  %186 = vst.msk [vmem:[%s176_s20] sm:$0xf] %vm185_vm0, %v374_v1  ;;  %s180_s23 = scalar_lea.vmem %s432_s2, %s319_s14 }
  0x10   : > { %v191_v2 = vcombine.high %v188_v0, %v188_v0  ;;  %v194_v3 = vsel %vm193_vm1, %v188_v0, 0.0  ;;  %v203_v4 = vmul.f32 %v188_v0, %v188_v0  ;;  %187 = vst.msk [vmem:[%s180_s23] sm:$0xf] %vm185_vm0, %v374_v1 }
  0x12   : > { %v195_v5 = vsel %vm193_vm1, %v191_v2, 0.0  ;;  %v205_v6 = vcombine.high %v203_v4, %v203_v4  ;;  %v207_v7 = vsel %vm193_vm1, %v203_v4, 0.0 }
  0x13   : > { %v196_v8 = vadd.f32 %v195_v5, %v194_v3 }
  0x14   : > { %v208_v9 = vsel %vm193_vm1, %v205_v6, 0.0 }
  0x15   : > { %197 = vadd.xlane.f32.xlu0 %v196_v8  ;;  %v209_v10 = vadd.f32 %v208_v9, %v207_v7 }
  0x16   : > { %v189_v11 = vld [vmem:[%s176_s20] sm:$0xf] }
  0x17   : > { %v202_v14 = vld [vmem:[%s180_s23] sm:$0xf] }
  0x19   : > { %210 = vadd.xlane.f32.xlu0 %v209_v10 }
  0x9e   : > { %v198_v12 = vpop.xlane.xlu0 %197 }
  0x9f   : > { %v199_v13 = vadd.f32 %v198_v12, %v189_v11 }
  0xa1   : > { %201 = vst.msk [vmem:[%s176_s20] sm:$0xf] %vm185_vm0, %v199_v13 }
  0xa2   : > { %v211_v15 = vpop.xlane.xlu0 %210 }
  0xa3   : > { %v212_v16 = vadd.f32 %v211_v15, %v202_v14 }
  0xa5   : > { %213 = vst.msk [vmem:[%s180_s23] sm:$0xf] %vm185_vm0, %v212_v16 }
  0xa6 PF: > { %s13_s11 = sadd.s32 1, %s372_s11   ;;  %s433_s9 = smov %s368_s10 }
  0xa7   : > { %p10_p5 = scmp.ge.s32.totalorder %s13_s11, 4   ;;  %s434_s10 = smov %s436_s12 }
  0xa9   :  { %12 = sbr.rel (!%p10_p5) target bundleno = 2 (0x2), region = 70 }

// kernel: eam_block_forward.3
= control target key start
LH: loop header
LB: loop body
LE: loop exit
PB: predicated region body
PF: predicated region fallthrough
CT: control target
= control target key end

     0   :  { %s425_s12 = smov 0   ;;  %s427_s13 = smov 0   ;;  %s464_s0 = inlined_call_operand.vmem [shape: f32[2,4,256], index: 0, kind: input, shape index: {}]   ;;  %s465_s1 = inlined_call_operand.vmem [shape: f32[4,1], index: 1, kind: input, shape index: {}]   ;;  %s466_s2 = inlined_call_operand.vmem [shape: f32[4,1], index: 2, kind: input, shape index: {}]   ;;  %s467_s3 = inlined_call_operand.vmem [shape: f32[2,4,256], index: 3, kind: output, shape index: {}]  }
   0x1   :  { %s429_s14 = smov 0  }
   0x2 LB: > { %s25_s15 = sadd.s32 1, %s397_s13  ;;  %p338_p0 = scmp.ge.s32.totalorder %s401_s14, 1  ;;  %s401_s14 = sphi %s429_s14, %s13_s14   ;;  %s397_s13 = sphi %s427_s13, %s469_s13   ;;  %s393_s12 = sphi %s425_s12, %s468_s12  }
   0x3   : > { %p27_p1 = scmp.ge.s32.totalorder %s25_s15, 2  ;;  %p158_p2 = scmp.lt.s32.totalorder %s401_s14, 3 }
   0x5   : > { %s471_s15 = smov (%p27_p1, %s25_s15), 0  ;;  %p159_p3 = pnand %p338_p0, %p158_p2 }
   0x6   : > { %p191_p4 = scmp.lt.s32.totalorder (!%p159_p3), %s393_s12, 1 }
   0x7   : > { %162 = sbr.rel (%p159_p3) target bundleno = 181 (0xb5), region = 32 }
   0xc   : > { %v211_v0 = vld [vmem:[%s465_s1] sm:$0xf]  ;;  %v403_v1 = vmov 0   ;;  %v404_v3 = vmov 839922192   ;;  %v219_v5 = vlaneseq  ;;  %s473_s12 = smov (!%p191_p4, %s393_s12), 1 }
   0xd   : > { %374 = vset.pattern.permute.xlu0 %v403_v1  ;;  %v225_v2 = vld [vmem:[%s466_s2] sm:$0xf]  ;;  %v217_v4 = vunpack.c.l.s4 %v404_v3  ;;  %s346_s20 = sshll.u32 %s473_s12, 3 }
   0xe   : > { %214 = vperm.xlu0 %374, %v211_v0   ;;  %v220_v7 = vshrl.u32 %v219_v5, 7  ;;  %s198_s23 = scalar_lea.vmem %s464_s0, %s346_s20  ;;  %s208_s26 = scalar_lea.vmem %s467_s3, %s346_s20 }
   0xf   : > { %v218_v6 = vunpack.c.0.s8 %v217_v4  ;;  %v210_v11 = vld [vmem:[%s198_s23] sm:$0xff] }
  0x11   : > { %v221_v8 = vsub.s32 %v218_v6, %v220_v7 }
  0x12   : > { %228 = vperm.xlu0 %374, %v225_v2  }
  0x89   : > { %v215_v9 = vpop.permute.xlu0 %214 }
  0x8a   : > { %v222_v10 = vrot.slane %v215_v9, %v221_v8 }
  0x8c   : > { %v224_v13 = vmul.f32 %v222_v10, %v210_v11 }
  0x8d   : > { %v229_v12 = vpop.permute.xlu0 %228 }
  0x8e   : > { %v236_v14 = vrot.slane %v229_v12, %v221_v8 }
  0x90   : > { %v238_v15 = vadd.f32 %v236_v14, %v224_v13 }
  0x92   : > { %v343_v16 = vmul.f32 -1.442695, %v238_v15 }
  0x94   : > { %375 = vpow2.f32 %v343_v16 }
  0xa1   : > { %v376_v17 = vpop.eup %375 }
  0xa2   : > { %v242_v18 = vadd.f32 1.0, %v376_v17 }
  0xa4   : > { %377 = vrcp.f32 %v242_v18 }
  0xb1   : > { %v378_v19 = vpop.eup %377 }
  0xb2   : > { %v245_v20 = vmul.f32 %v378_v19, %v210_v11 }
  0xb4   : > { %246 = vst [vmem:[%s208_s26] sm:$0xff] %v245_v20 }
  0xb5 PF: > { %s13_s14 = sadd.s32 1, %s401_s14   ;;  %s468_s12 = smov %s397_s13 }
  0xb6   : > { %p10_p5 = scmp.ge.s32.totalorder %s13_s14, 4   ;;  %s469_s13 = smov %s471_s15 }
  0xb8   :  { %12 = sbr.rel (!%p10_p5) target bundleno = 2 (0x2), region = 62 }

</bundles_post_ra>
